<compile_context>
chip_gen: v5e
topology: v5e:2x2
jax: 0.10.0
libtpu: 0.0.40
codegen_flags: <defaults>
</compile_context>

<pallas_src>
import functools

import jax
import jax.numpy as jnp
from jax.experimental import pallas as pl
from jax.experimental.pallas import tpu as pltpu

LN_EPS = 1e-5  # PyTorch nn.LayerNorm default


def _round_up(x, m):
    return ((x + m - 1) // m) * m


def _ffn_kernel(x_ref, w1_ref, b1_ref, w2_ref, b2_ref, gamma_ref, beta_ref,
                o_ref, *, d_model):
    # x_ref : (TM, Dp) f32          (Dp = d_model padded to a multiple of 128)
    # w1_ref: (Dp, Fp) bf16   b1_ref: (1, Fp) f32
    # w2_ref: (Fp, Dp) bf16   b2_ref: (1, Dp) f32
    # gamma_ref / beta_ref: (1, Dp) f32
    x = x_ref[...]

    # Linear1 (bf16 MXU, f32 accumulate) + bias + ReLU.
    # Dropout == identity at inference.
    h = jnp.dot(x.astype(jnp.bfloat16), w1_ref[...],
                preferred_element_type=jnp.float32) + b1_ref[...]
    h = jnp.maximum(h, 0.0)

    # Linear2 (bf16 MXU, f32 accumulate) + bias + residual.
    y = jnp.dot(h.astype(jnp.bfloat16), w2_ref[...],
                preferred_element_type=jnp.float32) + b2_ref[...] + x

    # LayerNorm over the real d_model columns only (padded columns of y are
    # exactly 0 by construction: zero-padded x / W2 columns / b2).
    d_pad = y.shape[-1]
    inv_d = 1.0 / d_model
    mean = jnp.sum(y, axis=-1, keepdims=True) * inv_d
    col = jax.lax.broadcasted_iota(jnp.int32, (1, d_pad), 1)
    diff = jnp.where(col < d_model, y - mean, 0.0)
    var = jnp.sum(diff * diff, axis=-1, keepdims=True) * inv_d
    y_hat = diff * jax.lax.rsqrt(var + LN_EPS)
    o_ref[...] = y_hat * gamma_ref[...] + beta_ref[...]


@functools.partial(jax.jit, static_argnames=("tile_rows",))
def simple_feed_forward(x, w1, b1, w2, b2, gamma, beta, *, tile_rows=256):
    """x: (..., d_model) float32.  Returns same shape / dtype float32."""
    orig_shape = x.shape
    d_model = orig_shape[-1]
    d_ff = w1.shape[1]

    x2d = x.reshape(-1, d_model).astype(jnp.float32)
    rows = x2d.shape[0]

    # Lane-dense feature padding (multiples of 128).
    d_pad = _round_up(d_model, 128)
    f_pad = _round_up(d_ff, 128)

    # Row tile: multiple of 8, default 256 (fills the 128/256-wide MXU),
    # clamped for tiny inputs.  Rows padded up to a multiple of the tile.
    tm = min(_round_up(tile_rows, 8), _round_up(rows, 8))
    n_tiles = int(pl.cdiv(rows, tm))
    rows_pad = n_tiles * tm

    x_p = jnp.pad(x2d, ((0, rows_pad - rows), (0, d_pad - d_model)))

    # Weights in bf16 (MXU-native), zero padded; epilogue params stay f32.
    w1_p = jnp.pad(w1, ((0, d_pad - d_model), (0, f_pad - d_ff))).astype(jnp.bfloat16)
    w2_p = jnp.pad(w2, ((0, f_pad - d_ff), (0, d_pad - d_model))).astype(jnp.bfloat16)
    b1_p = jnp.pad(b1, (0, f_pad - d_ff)).reshape(1, f_pad).astype(jnp.float32)
    b2_p = jnp.pad(b2, (0, d_pad - d_model)).reshape(1, d_pad).astype(jnp.float32)
    g_p = jnp.pad(gamma, (0, d_pad - d_model)).reshape(1, d_pad).astype(jnp.float32)
    be_p = jnp.pad(beta, (0, d_pad - d_model)).reshape(1, d_pad).astype(jnp.float32)

    # VMEM footprint: pipelined tiles are double-buffered; weights are resident
    # (constant index_map) but also allocated double-buffered by the pipeline.
    footprint = (
        2 * tm * d_pad * 4                    # x tiles (f32, double-buffered)
        + 2 * tm * d_pad * 4                  # out tiles
        + 2 * d_pad * f_pad * 2               # W1 (bf16)
        + 2 * f_pad * d_pad * 2               # W2 (bf16)
        + 2 * (f_pad + 3 * d_pad) * 4         # b1, b2, gamma, beta
        + tm * f_pad * 4 + 2 * tm * d_pad * 4  # in-kernel intermediates (h, y)
    )
    vmem_limit = int(min(64 * 1024 * 1024, max(32 * 1024 * 1024, 2 * footprint)))

    kernel = functools.partial(_ffn_kernel, d_model=d_model)

    out = pl.pallas_call(
        kernel,
        out_shape=jax.ShapeDtypeStruct((rows_pad, d_pad), jnp.float32),
        grid_spec=pltpu.PrefetchScalarGridSpec(
            num_scalar_prefetch=0,
            grid=(n_tiles,),
            in_specs=[
                pl.BlockSpec((tm, d_pad), lambda i: (i, 0)),     # x tile
                pl.BlockSpec((d_pad, f_pad), lambda i: (0, 0)),  # W1 (resident)
                pl.BlockSpec((1, f_pad), lambda i: (0, 0)),      # b1
                pl.BlockSpec((f_pad, d_pad), lambda i: (0, 0)),  # W2 (resident)
                pl.BlockSpec((1, d_pad), lambda i: (0, 0)),      # b2
                pl.BlockSpec((1, d_pad), lambda i: (0, 0)),      # gamma
                pl.BlockSpec((1, d_pad), lambda i: (0, 0)),      # beta
            ],
            out_specs=pl.BlockSpec((tm, d_pad), lambda i: (i, 0)),
        ),
        compiler_params=pltpu.CompilerParams(
            dimension_semantics=("parallel",),   # shard rows across v7x's 2 TCs
            vmem_limit_bytes=vmem_limit,
        ),
    )(x_p, w1_p, b1_p, w2_p, b2_p, g_p, be_p)

    return out[:rows, :d_model].reshape(orig_shape)


def _reference(x, w1, b1, w2, b2, gamma, beta, *, use_bf16):
    if use_bf16:
        h = jnp.dot(x.astype(jnp.bfloat16), w1.astype(jnp.bfloat16),
                    preferred_element_type=jnp.float32) + b1
        h = jnp.maximum(h, 0.0)
        y = jnp.dot(h.astype(jnp.bfloat16), w2.astype(jnp.bfloat16),
                    preferred_element_type=jnp.float32) + b2 + x
    else:
        h = jnp.maximum(x @ w1 + b1, 0.0)
        y = h @ w2 + b2 + x
    mean = jnp.mean(y, axis=-1, keepdims=True)
    var = jnp.mean((y - mean) ** 2, axis=-1, keepdims=True)
    return (y - mean) * jax.lax.rsqrt(var + LN_EPS) * gamma + beta


if __name__ == "__main__":
    # Small shapes: batch=2, seq=8, d_model=32  ->  d_ff = 2*d_model = 64
    B, S, D = 2, 8, 32
    D_FF = 2 * D

    key = jax.random.PRNGKey(0)
    kx, k1, k2, k3, k4 = jax.random.split(key, 5)

    x = jax.random.normal(kx, (B, S, D), dtype=jnp.float32)

    # Deterministic parameter init (shapes match nn.Linear / nn.LayerNorm).
    # nn.Linear weight is (out, in); we store the transpose (in, out) for the kernel.
    bound1 = 1.0 / (D ** 0.5)
    w1 = jax.random.uniform(k1, (D, D_FF), jnp.float32, -bound1, bound1)
    b1 = jax.random.uniform(k2, (D_FF,), jnp.float32, -bound1, bound1)
    bound2 = 1.0 / (D_FF ** 0.5)
    w2 = jax.random.uniform(k3, (D_FF, D), jnp.float32, -bound2, bound2)
    b2 = jax.random.uniform(k4, (D,), jnp.float32, -bound2, bound2)
    gamma = jnp.ones((D,), jnp.float32)   # LayerNorm weight init
    beta = jnp.zeros((D,), jnp.float32)   # LayerNorm bias init

    out = simple_feed_forward(x, w1, b1, w2, b2, gamma, beta)
    out = jax.block_until_ready(out)

    assert out.shape == x.shape
    assert not bool(jnp.any(jnp.isnan(out)))

    # Check against a reference using the same bf16 MXU matmul precision.
    ref_bf16 = _reference(x, w1, b1, w2, b2, gamma, beta, use_bf16=True)
    assert jnp.allclose(out, ref_bf16, atol=2e-3, rtol=2e-3), "mismatch vs bf16 reference"

    # Check against the pure-f32 reference with tolerance relaxed for the
    # bf16 matmul quantization (per review note).
    ref_f32 = _reference(x, w1, b1, w2, b2, gamma, beta, use_bf16=False)
    assert jnp.allclose(out, ref_f32, atol=3e-2, rtol=3e-2), "mismatch vs f32 reference"

    print("KERNEL_OK")
</pallas_src>

<mosaic_0001>
module attributes {stable_mosaic.version = 11 : i64} {
  func.func @_ffn_kernel(%arg0: i32, %arg1: memref<16x128xf32, #tpu.memory_space<vmem>>, %arg2: memref<128x128xbf16, #tpu.memory_space<vmem>>, %arg3: memref<1x128xf32, #tpu.memory_space<vmem>>, %arg4: memref<128x128xbf16, #tpu.memory_space<vmem>>, %arg5: memref<1x128xf32, #tpu.memory_space<vmem>>, %arg6: memref<1x128xf32, #tpu.memory_space<vmem>>, %arg7: memref<1x128xf32, #tpu.memory_space<vmem>>, %arg8: memref<16x128xf32, #tpu.memory_space<vmem>>) attributes {dimension_semantics = [#tpu.dimension_semantics<parallel>], iteration_bounds = array<i64: 1>, scalar_prefetch = 0 : i64, scratch_operands = 0 : i64, tpu.core_type = #tpu.core_type<tc>, window_params = [{transform_indices = @transform_0, window_bounds = array<i64: 16, 128>}, {pipeline_mode = #tpu.pipeline_mode<synchronous>, transform_indices = @transform_1, window_bounds = array<i64: 128, 128>}, {pipeline_mode = #tpu.pipeline_mode<synchronous>, transform_indices = @transform_2, window_bounds = array<i64: 1, 128>}, {pipeline_mode = #tpu.pipeline_mode<synchronous>, transform_indices = @transform_3, window_bounds = array<i64: 128, 128>}, {pipeline_mode = #tpu.pipeline_mode<synchronous>, transform_indices = @transform_4, window_bounds = array<i64: 1, 128>}, {pipeline_mode = #tpu.pipeline_mode<synchronous>, transform_indices = @transform_5, window_bounds = array<i64: 1, 128>}, {pipeline_mode = #tpu.pipeline_mode<synchronous>, transform_indices = @transform_6, window_bounds = array<i64: 1, 128>}, {transform_indices = @transform_7, window_bounds = array<i64: 16, 128>}]} {
    %c0 = arith.constant 0 : index
    %c0_0 = arith.constant 0 : index
    %0 = vector.load %arg1[%c0, %c0_0] : memref<16x128xf32, #tpu.memory_space<vmem>>, vector<16x128xf32>
    %1 = arith.truncf %0 : vector<16x128xf32> to vector<16x128xbf16>
    %c0_1 = arith.constant 0 : index
    %c0_2 = arith.constant 0 : index
    %2 = vector.load %arg2[%c0_1, %c0_2] : memref<128x128xbf16, #tpu.memory_space<vmem>>, vector<128x128xbf16>
    %cst = arith.constant dense<0.000000e+00> : vector<16x128xf32>
    %3 = tpu.matmul %1, %2, %cst {dimension_numbers = #tpu.dot_dimension_numbers<[1], [0], [0], [1], [0, 0, 1, 1], [], []>} : vector<16x128xbf16>, vector<128x128xbf16>, vector<16x128xf32> -> vector<16x128xf32>
    %c0_3 = arith.constant 0 : index
    %c0_4 = arith.constant 0 : index
    %4 = vector.load %arg3[%c0_3, %c0_4] : memref<1x128xf32, #tpu.memory_space<vmem>>, vector<1x128xf32>
    %5 = vector.broadcast %4 : vector<1x128xf32> to vector<16x128xf32>
    %6 = arith.addf %3, %5 : vector<16x128xf32>
    %cst_5 = arith.constant 0.000000e+00 : f32
    %7 = vector.broadcast %cst_5 : f32 to vector<16x128xf32>
    %8 = arith.maximumf %6, %7 : vector<16x128xf32>
    %9 = arith.truncf %8 : vector<16x128xf32> to vector<16x128xbf16>
    %c0_6 = arith.constant 0 : index
    %c0_7 = arith.constant 0 : index
    %10 = vector.load %arg4[%c0_6, %c0_7] : memref<128x128xbf16, #tpu.memory_space<vmem>>, vector<128x128xbf16>
    %cst_8 = arith.constant dense<0.000000e+00> : vector<16x128xf32>
    %11 = tpu.matmul %9, %10, %cst_8 {dimension_numbers = #tpu.dot_dimension_numbers<[1], [0], [0], [1], [0, 0, 1, 1], [], []>} : vector<16x128xbf16>, vector<128x128xbf16>, vector<16x128xf32> -> vector<16x128xf32>
    %c0_9 = arith.constant 0 : index
    %c0_10 = arith.constant 0 : index
    %12 = vector.load %arg5[%c0_9, %c0_10] : memref<1x128xf32, #tpu.memory_space<vmem>>, vector<1x128xf32>
    %13 = vector.broadcast %12 : vector<1x128xf32> to vector<16x128xf32>
    %14 = arith.addf %11, %13 : vector<16x128xf32>
    %15 = arith.addf %14, %0 : vector<16x128xf32>
    %cst_11 = arith.constant dense<0.000000e+00> : vector<16xf32>
    %16 = vector.multi_reduction <add>, %15, %cst_11 [1] : vector<16x128xf32> to vector<16xf32>
    %17 = vector.shape_cast %16 : vector<16xf32> to vector<16x1xf32>
    %cst_12 = arith.constant 3.125000e-02 : f32
    %18 = vector.broadcast %cst_12 : f32 to vector<16x1xf32>
    %19 = arith.mulf %17, %18 : vector<16x1xf32>
    %20 = tpu.iota {dimensions = array<i32: 1>} : vector<1x128xi32>
    %c32_i32 = arith.constant 32 : i32
    %21 = vector.broadcast %c32_i32 : i32 to vector<1x128xi32>
    %22 = arith.cmpi slt, %20, %21 : vector<1x128xi32>
    %23 = vector.broadcast %19 : vector<16x1xf32> to vector<16x128xf32>
    %24 = arith.subf %15, %23 : vector<16x128xf32>
    %cst_13 = arith.constant 0.000000e+00 : f32
    %25 = vector.shape_cast %22 : vector<1x128xi1> to vector<1x128xi1>
    %26 = vector.broadcast %25 : vector<1x128xi1> to vector<16x128xi1>
    %27 = vector.broadcast %cst_13 : f32 to vector<16x128xf32>
    %28 = arith.select %26, %24, %27 : vector<16x128xi1>, vector<16x128xf32>
    %29 = arith.mulf %28, %28 : vector<16x128xf32>
    %cst_14 = arith.constant dense<0.000000e+00> : vector<16xf32>
    %30 = vector.multi_reduction <add>, %29, %cst_14 [1] : vector<16x128xf32> to vector<16xf32>
    %31 = vector.shape_cast %30 : vector<16xf32> to vector<16x1xf32>
    %cst_15 = arith.constant 3.125000e-02 : f32
    %32 = vector.broadcast %cst_15 : f32 to vector<16x1xf32>
    %33 = arith.mulf %31, %32 : vector<16x1xf32>
    %cst_16 = arith.constant 9.99999974E-6 : f32
    %34 = vector.broadcast %cst_16 : f32 to vector<16x1xf32>
    %35 = arith.addf %33, %34 : vector<16x1xf32>
    %36 = math.rsqrt %35 : vector<16x1xf32>
    %37 = vector.broadcast %36 : vector<16x1xf32> to vector<16x128xf32>
    %38 = arith.mulf %28, %37 : vector<16x128xf32>
    %c0_17 = arith.constant 0 : index
    %c0_18 = arith.constant 0 : index
    %39 = vector.load %arg6[%c0_17, %c0_18] : memref<1x128xf32, #tpu.memory_space<vmem>>, vector<1x128xf32>
    %40 = vector.broadcast %39 : vector<1x128xf32> to vector<16x128xf32>
    %41 = arith.mulf %38, %40 : vector<16x128xf32>
    %c0_19 = arith.constant 0 : index
    %c0_20 = arith.constant 0 : index
    %42 = vector.load %arg7[%c0_19, %c0_20] : memref<1x128xf32, #tpu.memory_space<vmem>>, vector<1x128xf32>
    %43 = vector.broadcast %42 : vector<1x128xf32> to vector<16x128xf32>
    %44 = arith.addf %41, %43 : vector<16x128xf32>
    %c0_21 = arith.constant 0 : index
    %c0_22 = arith.constant 0 : index
    %45 = vector.load %arg8[%c0_21, %c0_22] : memref<16x128xf32, #tpu.memory_space<vmem>>, vector<16x128xf32>
    tpu.vector_store %arg8[%c0_21, %c0_22], %44 {strides = array<i32>} : memref<16x128xf32, #tpu.memory_space<vmem>>, vector<16x128xf32>,
    return
  }
  func.func @transform_0(%arg0: i32) -> (i32, i32) {
    %c0_i32 = arith.constant 0 : i32
    %c0_i32_0 = arith.constant 0 : i32
    return %arg0, %c0_i32 : i32, i32
  }
  func.func @transform_1(%arg0: i32) -> (i32, i32) {
    %c0_i32 = arith.constant 0 : i32
    %c0_i32_0 = arith.constant 0 : i32
    %c0_i32_1 = arith.constant 0 : i32
    return %c0_i32, %c0_i32_0 : i32, i32
  }
  func.func @transform_2(%arg0: i32) -> (i32, i32) {
    %c0_i32 = arith.constant 0 : i32
    %c0_i32_0 = arith.constant 0 : i32
    %c0_i32_1 = arith.constant 0 : i32
    return %c0_i32, %c0_i32_0 : i32, i32
  }
  func.func @transform_3(%arg0: i32) -> (i32, i32) {
    %c0_i32 = arith.constant 0 : i32
    %c0_i32_0 = arith.constant 0 : i32
    %c0_i32_1 = arith.constant 0 : i32
    return %c0_i32, %c0_i32_0 : i32, i32
  }
  func.func @transform_4(%arg0: i32) -> (i32, i32) {
    %c0_i32 = arith.constant 0 : i32
    %c0_i32_0 = arith.constant 0 : i32
    %c0_i32_1 = arith.constant 0 : i32
    return %c0_i32, %c0_i32_0 : i32, i32
  }
  func.func @transform_5(%arg0: i32) -> (i32, i32) {
    %c0_i32 = arith.constant 0 : i32
    %c0_i32_0 = arith.constant 0 : i32
    %c0_i32_1 = arith.constant 0 : i32
    return %c0_i32, %c0_i32_0 : i32, i32
  }
  func.func @transform_6(%arg0: i32) -> (i32, i32) {
    %c0_i32 = arith.constant 0 : i32
    %c0_i32_0 = arith.constant 0 : i32
    %c0_i32_1 = arith.constant 0 : i32
    return %c0_i32, %c0_i32_0 : i32, i32
  }
  func.func @transform_7(%arg0: i32) -> (i32, i32) {
    %c0_i32 = arith.constant 0 : i32
    %c0_i32_0 = arith.constant 0 : i32
    return %arg0, %c0_i32 : i32, i32
  }
}

</mosaic_0001>

<bundles_post_ra>
// kernel: simple_feed_forward.1
= control target key start
LH: loop header
LB: loop body
LE: loop exit
PB: predicated region body
PF: predicated region fallthrough
CT: control target
= control target key end

     0   :  { %v204_v34 = vlaneseq  ;;  %s463_s1 = inlined_call_operand.vmem [shape: bf16[128,128], index: 1, kind: input, shape index: {}]   ;;  %s464_s3 = inlined_call_operand.vmem [shape: bf16[128,128], index: 3, kind: input, shape index: {}]   ;;  %s465_s2 = inlined_call_operand.vmem [shape: f32[1,128], index: 2, kind: input, shape index: {}]   ;;  %s466_s0 = inlined_call_operand.vmem [shape: f32[16,128], index: 0, kind: input, shape index: {}]   ;;  %s467_s4 = inlined_call_operand.vmem [shape: f32[1,128], index: 4, kind: input, shape index: {}]   ;;  %s468_s5 = inlined_call_operand.vmem [shape: f32[1,128], index: 5, kind: input, shape index: {}]   ;;  %s469_s6 = inlined_call_operand.vmem [shape: f32[1,128], index: 6, kind: input, shape index: {}]   ;;  %s470_s7 = inlined_call_operand.vmem [shape: f32[16,128], index: 7, kind: output, shape index: {}]  }
   0x1   :  { %v334_v0 = vld [vmem:[%s463_s1 + $0x38] sm:$0xff]  ;;  %v333_v1 = vld [vmem:[%s463_s1 + $0x30] sm:$0xff]  ;;  %v332_v4 = vld [vmem:[%s463_s1 + $0x28] sm:$0xff] }
   0x2   :  { %97 = vmatpush.bf16.msra.mxu0 %v334_v0  ;;  %v342_v2 = vld [vmem:[%s464_s3 + $0x38] sm:$0xff]  ;;  %v341_v3 = vld [vmem:[%s464_s3 + $0x30] sm:$0xff]  ;;  %v340_v5 = vld [vmem:[%s464_s3 + $0x28] sm:$0xff]  ;;  %v205_v35 = vand.u32 127, %v204_v34 }
   0x3   :  { %182 = vmatpush.bf16.msra.mxu1 %v342_v2  ;;  %v331_v6 = vld [vmem:[%s463_s1 + $0x20] sm:$0xff]  ;;  %v330_v8 = vld [vmem:[%s463_s1 + $0x18] sm:$0xff]  ;;  %v329_v9 = vld [vmem:[%s463_s1 + $0x10] sm:$0xff] }
   0x4   :  { %v339_v7 = vld [vmem:[%s464_s3 + $0x20] sm:$0xff]  ;;  %v328_v10 = vld [vmem:[%s463_s1 + $0x8] sm:$0xff]  ;;  %v338_v15 = vld [vmem:[%s464_s3 + $0x18] sm:$0xff]  ;;  %vm206_vm0 = vcmp.lt.s32.totalorder %v205_v35, 32 }
   0x5   :  { %v327_v11 = vld [vmem:[%s463_s1] sm:$0xff]  ;;  %v27_v13 = vld [vmem:[%s466_s0 + $0x8] sm:$0xff]  ;;  %v337_v16 = vld [vmem:[%s464_s3 + $0x10] sm:$0xff] }
   0x6   :  { %98 = vmatpush.bf16.msra.mxu0 %v333_v1  ;;  %v26_v12 = vld [vmem:[%s466_s0] sm:$0xff]  ;;  %v336_v17 = vld [vmem:[%s464_s3 + $0x8] sm:$0xff] }
   0x7   :  { %183 = vmatpush.bf16.msra.mxu1 %v341_v3  ;;  %v28_v14 = vpack.c.bf16 %v27_v13, %v26_v12  ;;  %v335_v18 = vld [vmem:[%s464_s3] sm:$0xff] }
   0x8   :  { %v343_v20 = vld [vmem:[%s465_s2] ss:$0 sm:$0xff] }
   0x9   :  { %v344_v27 = vld [vmem:[%s467_s4] ss:$0 sm:$0xff] }
   0xa   :  { %99 = vmatpush.bf16.msra.mxu0 %v332_v4  ;;  %v345_v60 = vld [vmem:[%s468_s5] ss:$0 sm:$0xff] }
   0xb   :  { %184 = vmatpush.bf16.msra.mxu1 %v340_v5  ;;  %v346_v63 = vld [vmem:[%s469_s6] ss:$0 sm:$0xff] }
   0xe   :  { %100 = vmatpush.bf16.msra.mxu0 %v331_v6 }
   0xf   :  { %185 = vmatpush.bf16.msra.mxu1 %v339_v7 }
  0x12   :  { %101 = vmatpush.bf16.msra.mxu0 %v330_v8 }
  0x13   :  { %186 = vmatpush.bf16.msra.mxu1 %v338_v15 }
  0x16   :  { %102 = vmatpush.bf16.msra.mxu0 %v329_v9 }
  0x17   :  { %187 = vmatpush.bf16.msra.mxu1 %v337_v16 }
  0x1a   :  { %103 = vmatpush.bf16.msra.mxu0 %v328_v10 }
  0x1b   :  { %188 = vmatpush.bf16.msra.mxu1 %v336_v17 }
  0x1e   :  { %104 = vmatpush.bf16.msra.mxu0 %v327_v11 }
  0x1f   :  { %189 = vmatpush.bf16.msra.mxu1 %v335_v18 }
  0x21   :  { %105 = vmatmul.bf16.vlgmr.msra.gmra.mxu0 %v28_v14 }
  0x9e   :  { %v106_v19 = vpop.f32.mrf.mxu0 }
  0x9f   :  { %v107_v21 = vadd.f32 %v343_v20, %v106_v19 }
  0xa1   :  { %v111_v24 = vmax.f32 %v107_v21, 0.0 }
  0xa6   :  { %v108_v22 = vpop.f32.mrf.mxu0 }
  0xa7   :  { %v109_v23 = vadd.f32 %v343_v20, %v108_v22 }
  0xa9   :  { %v112_v25 = vmax.f32 %v109_v23, 0.0 }
  0xab   :  { %v113_v26 = vpack.c.bf16 %v112_v25, %v111_v24 }
  0xad   :  { %190 = vmatmul.bf16.vlgmr.msra.gmra.mxu1 %v113_v26 }
 0x12a   :  { %v191_v28 = vpop.f32.mrf.mxu1 }
 0x12b   :  { %v192_v29 = vadd.f32 %v344_v27, %v191_v28 }
 0x12d   :  { %v196_v30 = vadd.f32 %v192_v29, %v26_v12 }
 0x12f   :  { %198 = vadd.xlane.f32.xlu0 %v196_v30 }
 0x132   :  { %v193_v31 = vpop.f32.mrf.mxu1 }
 0x133   :  { %v194_v32 = vadd.f32 %v344_v27, %v193_v31 }
 0x135   :  { %v197_v33 = vadd.f32 %v194_v32, %v27_v13 }
 0x137   :  { %200 = vadd.xlane.f32.xlu0 %v197_v33 }
 0x1a2   :  { %v199_v36 = vpop.xlane.xlu0 %198 }
 0x1a3   :  { %v202_v37 = vmul.f32 0.03125, %v199_v36 }
 0x1a5   :  { %v207_v38 = vsub.f32 %v196_v30, %v202_v37 }
 0x1a7   :  { %v211_v39 = vsel %vm206_vm0, %v207_v38, 0.0 }
 0x1a8   :  { %v213_v40 = vmul.f32 %v211_v39, %v211_v39 }
 0x1aa   :  { %215 = vadd.xlane.f32.xlu1 %v213_v40  ;;  %v201_v41 = vpop.xlane.xlu0 %200 }
 0x1ab   :  { %v203_v42 = vmul.f32 0.03125, %v201_v41 }
 0x1ad   :  { %v208_v43 = vsub.f32 %v197_v33, %v203_v42 }
 0x1af   :  { %v212_v44 = vsel %vm206_vm0, %v208_v43, 0.0 }
 0x1b0   :  { %v214_v45 = vmul.f32 %v212_v44, %v212_v44 }
 0x1b2   :  { %217 = vadd.xlane.f32.xlu1 %v214_v45 }
 0x21d   :  { %v216_v46 = vpop.xlane.xlu1 %215 }
 0x21e   :  { %v219_v47 = vmul.f32 0.03125, %v216_v46 }
 0x220   :  { %v221_v48 = vadd.f32 1e-05, %v219_v47 }
 0x222   :  { %347 = vrsqrt.f32 %v221_v48  ;;  %vm229_vm2 = vweird.f32 %v221_v48 }
 0x225   :  { %v218_v49 = vpop.xlane.xlu1 %217 }
 0x226   :  { %v220_v50 = vmul.f32 0.03125, %v218_v49 }
 0x228   :  { %v348_v51 = vpop.eup %347  ;;  %v222_v52 = vadd.f32 1e-05, %v220_v50 }
 0x229   :  { %v224_v53 = vmul.f32 %v348_v51, %v221_v48  ;;  %vm230_vm1 = vweird.f32 %v348_v51 }
 0x22a   :  { %349 = vrsqrt.f32 %v222_v52  ;;  %vm231_vm3 = vmor %vm229_vm2, %vm230_vm1  ;;  %vm239_vm5 = vweird.f32 %v222_v52 }
 0x22b   :  { %v225_v54 = vmul.f32 %v348_v51, %v224_v53 }
 0x22d   :  { %v226_v55 = vmul.f32 0.5, %v225_v54 }
 0x22f   :  { %v227_v56 = vsub.f32 1.5, %v226_v55 }
 0x230   :  { %v350_v57 = vpop.eup %349 }
 0x231   :  { %v228_v58 = vmul.f32 %v348_v51, %v227_v56  ;;  %v234_v59 = vmul.f32 %v350_v57, %v222_v52  ;;  %vm240_vm4 = vweird.f32 %v350_v57 }
 0x232   :  { %vm241_vm6 = vmor %vm239_vm5, %vm240_vm4 }
 0x233   :  { %v232_v61 = vsel %vm231_vm3, %v348_v51, %v228_v58  ;;  %v235_v62 = vmul.f32 %v350_v57, %v234_v59 }
 0x234   :  { %v243_v0 = vmul.f32 %v232_v61, %v211_v39 }
 0x235   :  { %v236_v1 = vmul.f32 0.5, %v235_v62 }
 0x236   :  { %v249_v2 = vmul.f32 %v345_v60, %v243_v0 }
 0x237   :  { %v237_v3 = vsub.f32 1.5, %v236_v1 }
 0x238   :  { %v255_v4 = vadd.f32 %v346_v63, %v249_v2 }
 0x239   :  { %v238_v5 = vmul.f32 %v350_v57, %v237_v3 }
 0x23a   :  { %257 = vst [vmem:[%s470_s7] sm:$0xff] %v255_v4 }
 0x23b   :  { %v242_v6 = vsel %vm241_vm6, %v350_v57, %v238_v5 }
 0x23c   :  { %v244_v7 = vmul.f32 %v242_v6, %v212_v44 }
 0x23e   :  { %v250_v8 = vmul.f32 %v345_v60, %v244_v7 }
 0x240   :  { %v256_v9 = vadd.f32 %v346_v63, %v250_v8 }
 0x242   :  { %258 = vst [vmem:[%s470_s7 + $0x8] sm:$0xff] %v256_v9 }

</bundles_post_ra>
